<compile_context>
chip_gen: v5e
topology: v5e:2x2
jax: 0.10.0
libtpu: 0.0.40
codegen_flags: <defaults>
</compile_context>

<pallas_src>
import functools

import jax
import jax.numpy as jnp
from jax.experimental import pallas as pl
from jax.experimental.pallas import tpu as pltpu

_LANE = 128
_SUBLANE = 8
_MAX_ROWS = 1024  # sublane rows per block -> 1024*128*4B = 512 KiB per f32 input block


def _geometry_kernel(z_ref, vn_ref, un_ref, out_ref, *, a_x, b_x, a_y, b_y):
    # Input blocks:  (1, 1, ts, 128)   Output block: (1, 3, ts, 128)
    # ts is a multiple of 8 -> every vreg is fully populated, every store is
    # an unmasked full-width vst.
    z = z_ref[...]
    zf = z.astype(jnp.float32)
    x = zf * (vn_ref[...].astype(jnp.float32) * a_x + b_x)
    y = zf * (un_ref[...].astype(jnp.float32) * a_y + b_y)
    out_ref[:, 0:1, :, :] = x.astype(out_ref.dtype)
    out_ref[:, 1:2, :, :] = y.astype(out_ref.dtype)
    out_ref[:, 2:3, :, :] = z  # exact passthrough, matches torch.cat semantics


def _choose_rows(n_rows):
    """Pick a sublane-row tile (multiple of 8) and the padded row extent."""
    rows8 = pl.cdiv(n_rows, _SUBLANE) * _SUBLANE
    cap = min(_MAX_ROWS, rows8)
    # Prefer a tile that divides the 8-aligned extent exactly (no padding),
    # as long as it stays within 2x of the cap; otherwise pad to the cap.
    for t in range(cap, cap // 2 - 1, -_SUBLANE):
        if rows8 % t == 0:
            return t, rows8
    return cap, pl.cdiv(rows8, cap) * cap


def geometry_feature(z, vnorm, unorm, h, w, ch, cw, fh, fw):
    """Pallas implementation of GeometryFeature.forward (NCHW in / NCHW out).

    h, w, ch, cw, fh, fw are static camera intrinsics (Python scalars); they
    are folded into compile-time affine constants.
    """
    B, C, H, W = z.shape
    assert C == 1, "GeometryFeature expects single-channel z/vnorm/unorm"
    assert vnorm.shape == z.shape and unorm.shape == z.shape

    # Static intrinsics -> compile-time affine constants (f32 math).
    h, w, ch, cw, fh, fw = map(float, (h, w, ch, cw, fh, fw))
    a_x = 0.5 * h / fh
    b_x = (0.5 * h - ch) / fh
    a_y = 0.5 * w / fw
    b_y = (0.5 * w - cw) / fw

    HW = H * W
    hw128 = pl.cdiv(HW, _LANE) * _LANE
    n_rows = hw128 // _LANE
    ts, rows_pad = _choose_rows(n_rows)
    hw_pad = rows_pad * _LANE

    def _flat(arr):
        arr = arr.reshape(B, 1, HW)
        if hw_pad != HW:
            arr = jnp.pad(arr, ((0, 0), (0, 0), (0, hw_pad - HW)))
        return arr.reshape(B, 1, rows_pad, _LANE)

    zf, vf, uf = _flat(z), _flat(vnorm), _flat(unorm)

    grid = (B, rows_pad // ts)
    in_spec = pl.BlockSpec((1, 1, ts, _LANE), lambda b, s: (b, 0, s, 0))
    out_spec = pl.BlockSpec((1, 3, ts, _LANE), lambda b, s: (b, 0, s, 0))

    kernel = functools.partial(
        _geometry_kernel, a_x=a_x, b_x=b_x, a_y=a_y, b_y=b_y)

    out = pl.pallas_call(
        kernel,
        out_shape=jax.ShapeDtypeStruct((B, 3, rows_pad, _LANE), z.dtype),
        grid=grid,
        in_specs=[in_spec, in_spec, in_spec],
        out_specs=out_spec,
        compiler_params=pltpu.CompilerParams(
            dimension_semantics=("parallel", "parallel")),
    )(zf, vf, uf)

    out = out.reshape(B, 3, hw_pad)
    if hw_pad != HW:
        out = out[:, :, :HW]
    return out.reshape(B, 3, H, W)


def _reference(z, vnorm, unorm, h, w, ch, cw, fh, fw):
    x = z * (0.5 * h * (vnorm + 1.0) - ch) / fh
    y = z * (0.5 * w * (unorm + 1.0) - cw) / fw
    return jnp.concatenate((x, y, z), axis=1)


if __name__ == "__main__":
    key = jax.random.PRNGKey(0)
    k_z, k_v, k_u = jax.random.split(key, 3)

    B, H, W = 2, 16, 16
    # depth map (positive), normalized v/u coordinates in [-1, 1]
    z = jax.random.uniform(k_z, (B, 1, H, W), dtype=jnp.float32,
                           minval=0.1, maxval=10.0)
    vnorm = jax.random.uniform(k_v, (B, 1, H, W), dtype=jnp.float32,
                               minval=-1.0, maxval=1.0)
    unorm = jax.random.uniform(k_u, (B, 1, H, W), dtype=jnp.float32,
                               minval=-1.0, maxval=1.0)

    # camera-like scalar parameters
    h, w = float(H), float(W)
    ch, cw = h / 2.0, w / 2.0
    fh, fw = 10.0, 10.0

    out = geometry_feature(z, vnorm, unorm, h, w, ch, cw, fh, fw)
    out = jax.block_until_ready(out)

    ref = _reference(z, vnorm, unorm, h, w, ch, cw, fh, fw)
    assert out.shape == (B, 3, H, W), out.shape
    # Intrinsics are folded into fused affine constants (multiply-by-reciprocal
    # instead of divide), so allow a few ulps versus the literal formula.
    assert jnp.allclose(out, ref, atol=1e-5, rtol=1e-5), "mismatch vs reference"

    print("KERNEL_OK")
</pallas_src>

<mosaic_0001>
module attributes {stable_mosaic.version = 11 : i64} {
  func.func @_geometry_kernel(%arg0: i32, %arg1: i32, %arg2: memref<1x1x8x128xf32, #tpu.memory_space<vmem>>, %arg3: memref<1x1x8x128xf32, #tpu.memory_space<vmem>>, %arg4: memref<1x1x8x128xf32, #tpu.memory_space<vmem>>, %arg5: memref<1x3x8x128xf32, #tpu.memory_space<vmem>>) attributes {dimension_semantics = [#tpu.dimension_semantics<parallel>, #tpu.dimension_semantics<parallel>], iteration_bounds = array<i64: 2, 1>, scalar_prefetch = 0 : i64, scratch_operands = 0 : i64, tpu.core_type = #tpu.core_type<tc>, window_params = [{transform_indices = @transform_0, window_bounds = array<i64: 1, 1, 8, 128>}, {transform_indices = @transform_1, window_bounds = array<i64: 1, 1, 8, 128>}, {transform_indices = @transform_2, window_bounds = array<i64: 1, 1, 8, 128>}, {transform_indices = @transform_3, window_bounds = array<i64: 1, 3, 8, 128>}]} {
    %c0 = arith.constant 0 : index
    %c0_0 = arith.constant 0 : index
    %c0_1 = arith.constant 0 : index
    %c0_2 = arith.constant 0 : index
    %0 = vector.load %arg2[%c0, %c0_0, %c0_1, %c0_2] : memref<1x1x8x128xf32, #tpu.memory_space<vmem>>, vector<1x1x8x128xf32>
    %c0_3 = arith.constant 0 : index
    %c0_4 = arith.constant 0 : index
    %c0_5 = arith.constant 0 : index
    %c0_6 = arith.constant 0 : index
    %1 = vector.load %arg3[%c0_3, %c0_4, %c0_5, %c0_6] : memref<1x1x8x128xf32, #tpu.memory_space<vmem>>, vector<1x1x8x128xf32>
    %cst = arith.constant 8.000000e-01 : f32
    %2 = vector.broadcast %cst : f32 to vector<1x1x8x128xf32>
    %3 = arith.mulf %1, %2 : vector<1x1x8x128xf32>
    %cst_7 = arith.constant 0.000000e+00 : f32
    %4 = vector.broadcast %cst_7 : f32 to vector<1x1x8x128xf32>
    %5 = arith.addf %3, %4 : vector<1x1x8x128xf32>
    %6 = arith.mulf %0, %5 : vector<1x1x8x128xf32>
    %c0_8 = arith.constant 0 : index
    %c0_9 = arith.constant 0 : index
    %c0_10 = arith.constant 0 : index
    %c0_11 = arith.constant 0 : index
    %7 = vector.load %arg4[%c0_8, %c0_9, %c0_10, %c0_11] : memref<1x1x8x128xf32, #tpu.memory_space<vmem>>, vector<1x1x8x128xf32>
    %cst_12 = arith.constant 8.000000e-01 : f32
    %8 = vector.broadcast %cst_12 : f32 to vector<1x1x8x128xf32>
    %9 = arith.mulf %7, %8 : vector<1x1x8x128xf32>
    %cst_13 = arith.constant 0.000000e+00 : f32
    %10 = vector.broadcast %cst_13 : f32 to vector<1x1x8x128xf32>
    %11 = arith.addf %9, %10 : vector<1x1x8x128xf32>
    %12 = arith.mulf %0, %11 : vector<1x1x8x128xf32>
    %c0_14 = arith.constant 0 : index
    %c0_15 = arith.constant 0 : index
    %c0_16 = arith.constant 0 : index
    %c0_17 = arith.constant 0 : index
    %13 = vector.load %arg5[%c0_14, %c0_15, %c0_16, %c0_17] : memref<1x3x8x128xf32, #tpu.memory_space<vmem>>, vector<1x1x8x128xf32>
    tpu.vector_store %arg5[%c0_14, %c0_15, %c0_16, %c0_17], %6 {strides = array<i32>} : memref<1x3x8x128xf32, #tpu.memory_space<vmem>>, vector<1x1x8x128xf32>,
    %c0_18 = arith.constant 0 : index
    %c1 = arith.constant 1 : index
    %c0_19 = arith.constant 0 : index
    %c0_20 = arith.constant 0 : index
    %14 = vector.load %arg5[%c0_18, %c1, %c0_19, %c0_20] : memref<1x3x8x128xf32, #tpu.memory_space<vmem>>, vector<1x1x8x128xf32>
    tpu.vector_store %arg5[%c0_18, %c1, %c0_19, %c0_20], %12 {strides = array<i32>} : memref<1x3x8x128xf32, #tpu.memory_space<vmem>>, vector<1x1x8x128xf32>,
    %c0_21 = arith.constant 0 : index
    %c2 = arith.constant 2 : index
    %c0_22 = arith.constant 0 : index
    %c0_23 = arith.constant 0 : index
    %15 = vector.load %arg5[%c0_21, %c2, %c0_22, %c0_23] : memref<1x3x8x128xf32, #tpu.memory_space<vmem>>, vector<1x1x8x128xf32>
    tpu.vector_store %arg5[%c0_21, %c2, %c0_22, %c0_23], %0 {strides = array<i32>} : memref<1x3x8x128xf32, #tpu.memory_space<vmem>>, vector<1x1x8x128xf32>,
    return
  }
  func.func @transform_0(%arg0: i32, %arg1: i32) -> (i32, i32, i32, i32) {
    %c0_i32 = arith.constant 0 : i32
    %c0_i32_0 = arith.constant 0 : i32
    %c0_i32_1 = arith.constant 0 : i32
    return %arg0, %c0_i32, %arg1, %c0_i32_0 : i32, i32, i32, i32
  }
  func.func @transform_1(%arg0: i32, %arg1: i32) -> (i32, i32, i32, i32) {
    %c0_i32 = arith.constant 0 : i32
    %c0_i32_0 = arith.constant 0 : i32
    %c0_i32_1 = arith.constant 0 : i32
    return %arg0, %c0_i32, %arg1, %c0_i32_0 : i32, i32, i32, i32
  }
  func.func @transform_2(%arg0: i32, %arg1: i32) -> (i32, i32, i32, i32) {
    %c0_i32 = arith.constant 0 : i32
    %c0_i32_0 = arith.constant 0 : i32
    %c0_i32_1 = arith.constant 0 : i32
    return %arg0, %c0_i32, %arg1, %c0_i32_0 : i32, i32, i32, i32
  }
  func.func @transform_3(%arg0: i32, %arg1: i32) -> (i32, i32, i32, i32) {
    %c0_i32 = arith.constant 0 : i32
    %c0_i32_0 = arith.constant 0 : i32
    %c0_i32_1 = arith.constant 0 : i32
    return %arg0, %c0_i32, %arg1, %c0_i32_0 : i32, i32, i32, i32
  }
}

</mosaic_0001>

<bundles_post_ra>
// kernel: tpu_custom_call.1
= control target key start
LH: loop header
LB: loop body
LE: loop exit
PB: predicated region body
PF: predicated region fallthrough
CT: control target
= control target key end

     0   :  { %s894_s0 = inlined_call_operand.hbm [shape: f32[2,1,8,128], index: 0, kind: input, shape index: {}]   ;;  %s895_s1 = inlined_call_operand.hbm [shape: f32[2,1,8,128], index: 1, kind: input, shape index: {}]   ;;  %s896_s2 = inlined_call_operand.hbm [shape: f32[2,1,8,128], index: 2, kind: input, shape index: {}]   ;;  %s897_s3 = inlined_call_operand.hbm [shape: f32[2,3,8,128], index: 3, kind: output, shape index: {}]  }
   0x1   :  { %900 = sst [smem:[#allocation15_spill]] %s895_s1 }
   0x2   :  { %8 = vsyncpa [#allocation3], 0 }
   0x3   :  { %10 = vsyncpa [#allocation3 + $0x1], 0 }
   0x4   :  { %11 = vsyncpa [#allocation6], 0 }
   0x5   :  { %13 = vsyncpa [#allocation6 + $0x1], 0 }
   0x6   :  { %14 = vsyncpa [#allocation4], 0 }
   0x7   :  { %16 = vsyncpa [#allocation4 + $0x1], 0  ;;  %s741_s12 = smov 0   ;;  %s743_s13 = smov 0  }
   0x8   :  { %s745_s14 = smov 0   ;;  %s747_s15 = smov 0  }
   0x9   :  { %s749_s16 = smov 0   ;;  %s751_s17 = smov 0  }
   0xa LB: > { %901 = sst [smem:[#allocation12_spill]] %s713_s16  ;;  %s772_s18 = sadd.s32 4294967295, %s717_s17   ;;  %s717_s17 = sphi %s751_s17, %s22_s17   ;;  %s713_s16 = sphi %s749_s16, %s913_s16   ;;  %s709_s15 = sphi %s747_s15, %s912_s15   ;;  %s705_s14 = sphi %s745_s14, %s916_s14   ;;  %s701_s13 = sphi %s743_s13, %s915_s13   ;;  %s697_s12 = sphi %s741_s12, %s914_s12  }
   0xb   : > { %s447_s19 = sadd.s32 4294967294, %s717_s17   ;;  %s34_s20 = sadd.s32 1, %s713_s16 }
   0xc   : > { %s43_s21 = sadd.s32 1, %s705_s14  ;;  %p36_p0 = scmp.ge.s32.totalorder %s34_s20, 2 }
   0xd   : > { %p50_p1 = scmp.ne.s32.totalorder %s705_s14, %s701_s13  ;;  %p51_p2 = scmp.eq.s32.totalorder %s717_s17, 0 }
   0xe   : > { %p56_p3 = scmp.ne.s32.totalorder %s701_s13, %s697_s12  ;;  %s918_s20 = smov (%p36_p0, %s34_s20), 0 }
   0xf   : > { %902 = sst [smem:[#allocation13_spill]] %s918_s20  ;;  %p784_p4 = por %p51_p2, %p50_p1 }
  0x10   : > { %p57_p5 = scmp.eq.s32.totalorder %s772_s18, 0  ;;  %s38_s23 = ssub.s32 %s713_s16, %s918_s20 }
  0x11   : > { %p138_p6 = scmp.eq.s32.totalorder %s772_s18, 1  ;;  %p41_p7 = scmp.eq.s32.totalorder %s38_s23, 0 }
  0x12   : > { %p792_p8 = por %p57_p5, %p56_p3  ;;  %p144_p10 = scmp.eq.s32.totalorder %s447_s19, 1 }
  0x13   : > { %p796_p9 = por %p138_p6, %p50_p1  ;;  %p449_p12 = scmp.ge.s32.totalorder %s717_s17, 2 }
  0x14   : > { %s801_s26 = scalar_select %p41_p7, %s705_s14, %s43_s21  }
  0x15   : > { %p803_p11 = por %p144_p10, %p56_p3  ;;  %p489_p13 = scmp.lt.s32.totalorder %s717_s17, 2 }
  0x16   : > { %906 = sst [smem:[#allocation14_spill]] %s801_s26  ;;  %s164_s28 = sand.u32 1, %s705_s14  }
  0x17   : > { %s450_s29 = sshll.u32 %s164_s28, 3  ;;  %s451_s30 = sshll.u32 %s713_s16, 3 }
  0x18   : > { %p813_p0 = pnand %p489_p13, %p784_p4  ;;  %s184_s5 = sand.u32 1, %s717_s17  }
  0x19   : > { %s909_s1 = sld [smem:[#allocation15_spill]]  ;;  %s188_s10 = scalar_lea.vmem [#allocation5], %s450_s29 }
  0x1a   : > { %s197_s11 = sshll.u32 %s188_s10, 4  ;;  %s185_s19 = scalar_lea.sflag [#allocation6], %s184_s5  ;;  %s198_s11 = int_to_ptr.vmem [resolvable:$true] %s197_s11 }
  0x1b   : > { %p456_p1 = scmp.ge.s32.totalorder %s717_s17, 1  ;;  %p222_p2 = scmp.lt.s32.totalorder %s717_s17, 3 }
  0x1c   : > { %s173_s6 = scalar_lea.hbm %s894_s0, %s451_s30  ;;  %s165_s10 = scalar_lea.sflag [#allocation3], %s164_s28 }
  0x1d   : > { %p825_p3 = pnand %p456_p1, %p222_p2  ;;  %s175_s7 = sshll.u32 %s173_s6, 4  ;;  %s176_s7 = int_to_ptr.hbm [resolvable:$true] %s175_s7 }
  0x1e   : > { %s208_s16 = scalar_lea.vmem [#allocation7], %s450_s29  ;;  %s842_s22 = sand.u32 (!%p825_p3), 1, %s701_s13  }
  0x1f   : > { %s193_s8 = scalar_lea.hbm %s909_s1, %s451_s30  ;;  %s217_s26 = sshll.u32 %s208_s16, 4  ;;  %s218_s26 = int_to_ptr.vmem [resolvable:$true] %s217_s26 }
  0x20   : > { %s195_s9 = sshll.u32 %s193_s8, 4  ;;  %s168_s8 = scalar_lea.vmem [#allocation2], %s450_s29  ;;  %s196_s9 = int_to_ptr.hbm [resolvable:$true] %s195_s9 }
  0x21   : > { %481 = dma.hbm_to_vmem [thread:$0]  (!%p813_p0), %s196_s9, 128, %s198_s11, %s185_s19  }
  0x22   : > { %s177_s1 = sshll.u32 %s168_s8, 4  ;;  %s213_s11 = scalar_lea.hbm %s896_s2, %s451_s30  ;;  %s178_s1 = int_to_ptr.vmem [resolvable:$true] %s177_s1 }
  0x23   : > { %478 = dma.hbm_to_vmem [thread:$0]  (!%p813_p0), %s176_s7, 128, %s178_s1, %s165_s10  }
  0x24   : > { %s215_s20 = sshll.u32 %s213_s11, 4  ;;  %226 = sbr.rel (%p825_p3) target bundleno = 63 (0x3f), region = 32  ;;  %s216_s20 = int_to_ptr.hbm [resolvable:$true] %s215_s20 }
  0x25   : > { %484 = dma.hbm_to_vmem [thread:$0]  (!%p813_p0), %s216_s20, 128, %s218_s26, %s185_s19  }
  0x26   : > { %s457_s1 = sshll.u32 (!%p825_p3), %s842_s22, 3  ;;  %s229_s28 = scalar_lea.sflag (!%p825_p3), [#allocation3], %s842_s22 }
  0x27   : > { %s232_s23 = scalar_lea.vmem (!%p825_p3), [#allocation2], %s457_s1 }
  0x29   : > { %684 = dma.done.wait (%p792_p8), %s229_s28, 128  }
  0x2a   : > { %686 = vsyncadd (%p792_p8), %s229_s28, 4294967168  ;;  %s238_s16 = sand.u32 1, %s772_s18   ;;  %s242_s26 = scalar_lea.vmem [#allocation5], %s457_s1 }
  0x2b   : > { %s239_s20 = scalar_lea.sflag [#allocation6], %s238_s16 }
  0x2c   : > { %688 = dma.done.wait (%p792_p8), %s239_s20, 256  }
  0x2d   : > { %690 = vsyncadd (%p792_p8), %s239_s20, 4294967040  ;;  %s465_s29 = smul.u32 24, %s842_s22  ;;  %v286_v0 = vld [vmem:[%s232_s23] sm:$0xff]  ;;  %v287_v1 = vld [vmem:[%s242_s26] sm:$0xff]  ;;  %s252_s7 = scalar_lea.vmem [#allocation7], %s457_s1 }
  0x2e   : > { %s466_s30 = smul.u32 24, %s709_s15  ;;  %v291_v2 = vld [vmem:[%s252_s7] sm:$0xff]  ;;  %v288_v3 = vmul.f32 0.8, %v287_v1  ;;  %s301_s15 = scalar_lea.sflag [#allocation4], %s842_s22 }
  0x2f   : > { %s285_s6 = scalar_lea.vmem [#allocation8], %s465_s29  ;;  %v292_v4 = vmul.f32 0.8, %v291_v2  ;;  %s651_s11 = scalar_lea.hbm %s897_s3, 48 }
  0x30   : > { %s313_s21 = scalar_lea.hbm %s897_s3, %s466_s30  ;;  %s314_s18 = sshll.u32 %s285_s6, 4  ;;  %461 = vst [vmem:[%s285_s6 + $0x10] sm:$0xff] %v286_v0  ;;  %v290_v5 = vmul.f32 %v288_v3, %v286_v0  ;;  %s315_s18 = int_to_ptr.vmem [resolvable:$true] %s314_s18 }
  0x31   : > { %s316_s24 = sshll.u32 %s313_s21, 4  ;;  %v294_v6 = vmul.f32 %v292_v4, %v286_v0  ;;  %s317_s24 = int_to_ptr.hbm [resolvable:$true] %s316_s24 }
  0x32   : > { %295 = vst [vmem:[%s285_s6] sm:$0xff] %v290_v5  ;;  %s645_s8 = sshra.s32 %s317_s24, 4  ;;  %s646_s8 = int_to_ptr.hbm [resolvable:$true] %s645_s8 }
  0x33   : > { %460 = vst [vmem:[%s285_s6 + $0x8] sm:$0xff] %v294_v6  ;;  %s647_s10 = scalar_lea.hbm %s646_s8, 24  ;;  %p652_p7 = scmp.lt.s32.totalorder %s646_s8, %s897_s3 }
  0x34   : > { %p648_p4 = scmp.ne.s32.totalorder %s646_s8, %s647_s10  ;;  %p653_p8 = scmp.lt.s32.totalorder %s651_s11, %s647_s10 }
  0x36   : > { %p649_p5 = pnand %p648_p4, %p796_p9  ;;  %p654_p10 = por %p653_p8, %p652_p7 }
  0x38   : > { %p650_p6 = pneg %p649_p5 }
  0x3a   : > { %p655_p13 = pnand %p654_p10, %p650_p6 }
  0x3c   : > { %658 = shalt.err (!%p655_p13)
}
  0x3d   : > { %s719_s22 = smov 128   ;;  %s720_s23 = smov 8  }
  0x3e   : > { %473 = dma.vmem_to_hbm [thread:$0]  (%p796_p9), %s315_s18, 384, %s317_s24, %s301_s15, %s719_s22, %s719_s22, %s720_s23  }
  0x3f PF: > { %s331_s16 = sand.u32 1, %s697_s12   ;;  %p486_p0 = pnand %p449_p12, %p803_p11 }
  0x40   : > { %s332_s20 = scalar_lea.sflag [#allocation4], %s331_s16 }
  0x41   : > { %p487_p1 = pneg %p486_p0 }
  0x43   : > { %692 = dma.done.wait (%p487_p1), %s332_s20, 384  }
  0x44   : > { %694 = vsyncadd (%p487_p1), %s332_s20, 4294966912  ;;  %s22_s17 = sadd.s32 1, %s717_s17   ;;  %s911_s26 = sld [smem:[#allocation14_spill]] }
  0x45   : > { %p19_p2 = scmp.ge.s32.totalorder %s22_s17, 4   ;;  %s912_s15 = sld [smem:[#allocation12_spill]] }
  0x46   : > { %s913_s16 = sld [smem:[#allocation13_spill]]  ;;  %s914_s12 = smov %s701_s13 }
  0x47   : > { %s915_s13 = smov %s705_s14  ;;  %21 = sbr.rel (!%p19_p2) target bundleno = 10 (0xa), region = 103 }
  0x4a   : > { %s916_s14 = smov %s911_s26 }
  0x4c   :  { %338 = vsyncpa [#allocation3], 1 }
  0x4d   :  { %340 = vsyncpa [#allocation3 + $0x1], 1 }
  0x4e   :  { %341 = vsyncpa [#allocation6], 1 }
  0x4f   :  { %343 = vsyncpa [#allocation6 + $0x1], 1 }
  0x50   :  { %344 = vsyncpa [#allocation4], 1 }
  0x51   :  { %346 = vsyncpa [#allocation4 + $0x1], 1 }

</bundles_post_ra>
